<compile_context>
chip_gen: v5e
topology: v5e:2x2
jax: 0.10.0
libtpu: 0.0.40
codegen_flags: <defaults>
</compile_context>

<pallas_src>
import jax
import jax.numpy as jnp
from jax import lax
from jax.experimental import pallas as pl
from jax.experimental.pallas import tpu as pltpu

_EPS = 1e-5

# Matmul operand dtype.  On v6e/v7x this can be set to jnp.bfloat16 for MXU
# peak (accumulation + all BN/ReLU math stays in f32); kept at f32 here so the
# kernel matches the f32 reference to <1e-3 on every generation (incl. v5e).
_MATMUL_DTYPE = jnp.float32


def _band_weights(w_hwio, W, Cin, Cout):
    """Fold a (3,3,Cin,Cout) conv kernel into 3 block-tridiagonal matrices.

    bw[kh][w_in*Cin + ci, w*Cout + co] = w_hwio[kh, w_in - w + 1, ci, co]
    (zero outside |w_in - w| <= 1), so the kw taps and the W zero-padding are
    absorbed into the weight and each kh tap becomes a single lane-dense matmul.
    """
    taps = []
    for kh in range(3):
        m = jnp.zeros((W * Cin, W * Cout), jnp.float32)
        for kw in range(3):
            # eye(W, k=1-kw)[w_in, w] == 1  iff  w_in == w - 1 + kw
            m = m + jnp.kron(jnp.eye(W, k=1 - kw, dtype=jnp.float32),
                             w_hwio[kh, kw])
        taps.append(m)
    return jnp.stack(taps).astype(_MATMUL_DTYPE)


def _block_diag_weight(w_mat, W):
    """1x1 projection conv as a block-diagonal (W*Cin, W*Cout) matrix."""
    return jnp.kron(jnp.eye(W, dtype=jnp.float32),
                    w_mat.astype(jnp.float32)).astype(_MATMUL_DTYPE)


def _make_basic_block_kernel(N, H, W, Cin, Cout, has_projection):
    NH = N * H
    WCin = W * Cin
    WC = W * Cout
    inv_m = 1.0 / float(N * H * W)

    def kernel(xps_ref, bw1_ref, bw2_ref, sel_ref, selT_ref,
               g1_ref, b1_ref, g2_ref, b2_ref, *rest):
        if has_projection:
            bwsc_ref, gsc_ref, bsc_ref, o_ref, pad2_ref = rest
        else:
            o_ref, pad2_ref = rest

        ones_row = jnp.ones((1, NH), jnp.float32)   # hoisted; reused by all 3 BNs
        sel = sel_ref[...]                          # (W*Cout, Cout)  lane -> channel
        selT = selT_ref[...]                        # (Cout, W*Cout)  channel -> lane

        def bn_train(x_slab, g_ref, b_ref):
            # Single pass: per-lane sum / sum-sq on the MXU (ones-row matmul),
            # folded to per-channel via the selector, then applied as one
            # lane-dense scale/shift FMA.  Biased batch variance, f32 throughout.
            lane_sum = jnp.dot(ones_row, x_slab,
                               preferred_element_type=jnp.float32)        # (1, WC)
            lane_sumsq = jnp.dot(ones_row, x_slab * x_slab,
                                 preferred_element_type=jnp.float32)      # (1, WC)
            mean = jnp.dot(lane_sum, sel,
                           preferred_element_type=jnp.float32) * inv_m    # (1, Cout)
            ex2 = jnp.dot(lane_sumsq, sel,
                          preferred_element_type=jnp.float32) * inv_m
            var = ex2 - mean * mean
            inv = lax.rsqrt(var + _EPS)
            scale_c = g_ref[...] * inv                                    # (1, Cout)
            shift_c = b_ref[...] - mean * scale_c
            scale_lane = jnp.dot(scale_c, selT,
                                 preferred_element_type=jnp.float32)      # (1, WC)
            shift_lane = jnp.dot(shift_c, selT,
                                 preferred_element_type=jnp.float32)
            return x_slab * scale_lane + shift_lane

        # ---------- conv1 (3x3, pad=1) + bn1 + relu ----------
        # kh=1 tap is the unpadded input slab; it doubles as the shortcut input
        # (no extra relayout for the shortcut).
        x_mid = xps_ref[:, 1:H + 1, :].reshape(NH, WCin)
        acc1 = jnp.dot(x_mid.astype(_MATMUL_DTYPE), bw1_ref[1],
                       preferred_element_type=jnp.float32)
        acc1 = acc1 + jnp.dot(
            xps_ref[:, 0:H, :].reshape(NH, WCin).astype(_MATMUL_DTYPE),
            bw1_ref[0], preferred_element_type=jnp.float32)
        acc1 = acc1 + jnp.dot(
            xps_ref[:, 2:H + 2, :].reshape(NH, WCin).astype(_MATMUL_DTYPE),
            bw1_ref[2], preferred_element_type=jnp.float32)
        a1 = jnp.maximum(bn_train(acc1, g1_ref, b1_ref), 0.0)

        # ---------- H-halo scratch for conv2: zero ONLY the halo rows ----------
        pad2_ref[:, 0:1, :] = jnp.zeros((N, 1, WC), jnp.float32)
        pad2_ref[:, H + 1:H + 2, :] = jnp.zeros((N, 1, WC), jnp.float32)
        pad2_ref[:, 1:H + 1, :] = a1.reshape(N, H, WC)

        # ---------- conv2 (3x3, pad=1) + bn2 ----------
        acc2 = jnp.dot(
            pad2_ref[:, 0:H, :].reshape(NH, WC).astype(_MATMUL_DTYPE),
            bw2_ref[0], preferred_element_type=jnp.float32)
        acc2 = acc2 + jnp.dot(
            pad2_ref[:, 1:H + 1, :].reshape(NH, WC).astype(_MATMUL_DTYPE),
            bw2_ref[1], preferred_element_type=jnp.float32)
        acc2 = acc2 + jnp.dot(
            pad2_ref[:, 2:H + 2, :].reshape(NH, WC).astype(_MATMUL_DTYPE),
            bw2_ref[2], preferred_element_type=jnp.float32)
        a2 = bn_train(acc2, g2_ref, b2_ref)

        # ---------- shortcut ----------
        if has_projection:
            sc = jnp.dot(x_mid.astype(_MATMUL_DTYPE), bwsc_ref[...],
                         preferred_element_type=jnp.float32)
            sc = bn_train(sc, gsc_ref, bsc_ref)
        else:
            sc = x_mid   # Cin == Cout: x_mid already is the (NH, W*Cout) slab

        # Lane-dense (32, 128) unmasked store.
        o_ref[...] = jnp.maximum(a2 + sc, 0.0).astype(o_ref.dtype)

    return kernel


def basic_block_forward(x_nchw, params, stride=1):
    """Pallas implementation of BasicBlock.forward.  x_nchw: (N, Cin, H, W)."""
    assert stride == 1, "TODO(synk): only stride=1 implemented in this kernel"
    N, Cin, H, W = x_nchw.shape
    Cout = params["w1"].shape[0]
    has_projection = "wsc" in params
    if not has_projection:
        assert Cin == Cout, "identity shortcut requires in_planes == planes"

    f32 = jnp.float32
    NH, WCin, WC = N * H, W * Cin, W * Cout

    # Lane-packed row slabs (N, H, W*C); zero-pad H only (W padding is folded
    # into the band weights).
    x_slab = jnp.transpose(x_nchw, (0, 2, 3, 1)).astype(f32).reshape(N, H, WCin)
    x_slab_hpad = jnp.pad(x_slab, ((0, 0), (1, 1), (0, 0)))

    # PyTorch conv weights are OIHW -> HWIO, then folded into band matrices.
    w1 = jnp.transpose(params["w1"], (2, 3, 1, 0)).astype(f32)
    w2 = jnp.transpose(params["w2"], (2, 3, 1, 0)).astype(f32)
    bw1 = _band_weights(w1, W, Cin, Cout)      # (3, W*Cin,  W*Cout)
    bw2 = _band_weights(w2, W, Cout, Cout)     # (3, W*Cout, W*Cout)

    # Channel <-> lane selectors (lane index = w*Cout + c).
    selT = jnp.tile(jnp.eye(Cout, dtype=f32), (1, W))   # (Cout, W*Cout)
    sel = selT.T                                        # (W*Cout, Cout)

    g1 = params["g1"].reshape(1, Cout).astype(f32)
    b1 = params["b1"].reshape(1, Cout).astype(f32)
    g2 = params["g2"].reshape(1, Cout).astype(f32)
    b2 = params["b2"].reshape(1, Cout).astype(f32)

    inputs = [x_slab_hpad, bw1, bw2, sel, selT, g1, b1, g2, b2]
    if has_projection:
        wsc = params["wsc"].reshape(Cout, Cin).T.astype(f32)   # (Cin, Cout)
        inputs += [_block_diag_weight(wsc, W),
                   params["gsc"].reshape(1, Cout).astype(f32),
                   params["bsc"].reshape(1, Cout).astype(f32)]

    def full_spec(a):
        nd = a.ndim
        return pl.BlockSpec(a.shape, lambda i, _nd=nd: (0,) * _nd)

    kernel = _make_basic_block_kernel(N, H, W, Cin, Cout, has_projection)

    out_slab = pl.pallas_call(
        kernel,
        grid=(1,),
        in_specs=[full_spec(a) for a in inputs],
        out_specs=pl.BlockSpec((NH, WC), lambda i: (0, 0)),
        out_shape=jax.ShapeDtypeStruct((NH, WC), f32),
        scratch_shapes=[pltpu.VMEM((N, H + 2, WC), f32)],
        compiler_params=pltpu.CompilerParams(
            dimension_semantics=("arbitrary",)),
    )(*inputs)

    # (N*H, W*Cout) lane-dense slab -> NCHW
    return jnp.transpose(out_slab.reshape(N, H, W, Cout), (0, 3, 1, 2))


# ---------- plain-JAX reference (mirrors the PyTorch module, training-mode BN) ----------
def ref_forward(x, params, stride=1):
    def conv(y, w, s, pad):
        return lax.conv_general_dilated(
            y, w, (s, s), ((pad, pad), (pad, pad)),
            dimension_numbers=("NCHW", "OIHW", "NCHW"),
            precision=lax.Precision.HIGHEST)

    def bn(y, g, b):
        m = jnp.mean(y, axis=(0, 2, 3), keepdims=True)
        v = jnp.mean((y - m) ** 2, axis=(0, 2, 3), keepdims=True)
        return ((y - m) * lax.rsqrt(v + _EPS) * g.reshape(1, -1, 1, 1)
                + b.reshape(1, -1, 1, 1))

    out = jax.nn.relu(bn(conv(x, params["w1"], stride, 1), params["g1"], params["b1"]))
    out = bn(conv(out, params["w2"], 1, 1), params["g2"], params["b2"])
    if "wsc" in params:
        sc = bn(conv(x, params["wsc"], stride, 0), params["gsc"], params["bsc"])
    else:
        sc = x
    return jax.nn.relu(out + sc)


if __name__ == "__main__":
    key = jax.random.PRNGKey(0)
    N, Cin, H, W = 2, 4, 16, 16
    planes, stride = 8, 1  # in_planes != planes -> projection shortcut (1x1 conv + BN)
    ks = jax.random.split(key, 8)

    x = jax.random.normal(ks[0], (N, Cin, H, W), jnp.float32)
    params = {
        "w1": 0.2 * jax.random.normal(ks[1], (planes, Cin, 3, 3), jnp.float32),
        "g1": 1.0 + 0.1 * jax.random.normal(ks[2], (planes,), jnp.float32),
        "b1": 0.1 * jax.random.normal(ks[3], (planes,), jnp.float32),
        "w2": 0.2 * jax.random.normal(ks[4], (planes, planes, 3, 3), jnp.float32),
        "g2": 1.0 + 0.1 * jax.random.normal(ks[5], (planes,), jnp.float32),
        "b2": 0.1 * jax.random.normal(ks[6], (planes,), jnp.float32),
        "wsc": 0.2 * jax.random.normal(ks[7], (planes, Cin, 1, 1), jnp.float32),
        "gsc": jnp.ones((planes,), jnp.float32),
        "bsc": jnp.zeros((planes,), jnp.float32),
    }

    out = basic_block_forward(x, params, stride=stride)
    out = jax.block_until_ready(out)

    ref = ref_forward(x, params, stride=stride)
    assert out.shape == (N, planes, H, W), out.shape
    err = float(jnp.max(jnp.abs(out - ref)))
    assert err < 1e-3, f"max abs error vs reference: {err}"
    print("KERNEL_OK")
</pallas_src>

<mosaic_0001>
module attributes {stable_mosaic.version = 11 : i64} {
  func.func @kernel(%arg0: i32, %arg1: memref<2x18x64xf32, #tpu.memory_space<vmem>>, %arg2: memref<3x64x128xf32, #tpu.memory_space<vmem>>, %arg3: memref<3x128x128xf32, #tpu.memory_space<vmem>>, %arg4: memref<128x8xf32, #tpu.memory_space<vmem>>, %arg5: memref<8x128xf32, #tpu.memory_space<vmem>>, %arg6: memref<1x8xf32, #tpu.memory_space<vmem>>, %arg7: memref<1x8xf32, #tpu.memory_space<vmem>>, %arg8: memref<1x8xf32, #tpu.memory_space<vmem>>, %arg9: memref<1x8xf32, #tpu.memory_space<vmem>>, %arg10: memref<64x128xf32, #tpu.memory_space<vmem>>, %arg11: memref<1x8xf32, #tpu.memory_space<vmem>>, %arg12: memref<1x8xf32, #tpu.memory_space<vmem>>, %arg13: memref<32x128xf32, #tpu.memory_space<vmem>>, %arg14: memref<2x18x128xf32, #tpu.memory_space<vmem>>) attributes {dimension_semantics = [#tpu.dimension_semantics<arbitrary>], iteration_bounds = array<i64: 1>, scalar_prefetch = 0 : i64, scratch_operands = 1 : i64, tpu.core_type = #tpu.core_type<tc>, window_params = [{pipeline_mode = #tpu.pipeline_mode<synchronous>, transform_indices = @transform_0, window_bounds = array<i64: 2, 18, 64>}, {pipeline_mode = #tpu.pipeline_mode<synchronous>, transform_indices = @transform_1, window_bounds = array<i64: 3, 64, 128>}, {pipeline_mode = #tpu.pipeline_mode<synchronous>, transform_indices = @transform_2, window_bounds = array<i64: 3, 128, 128>}, {pipeline_mode = #tpu.pipeline_mode<synchronous>, transform_indices = @transform_3, window_bounds = array<i64: 128, 8>}, {pipeline_mode = #tpu.pipeline_mode<synchronous>, transform_indices = @transform_4, window_bounds = array<i64: 8, 128>}, {pipeline_mode = #tpu.pipeline_mode<synchronous>, transform_indices = @transform_5, window_bounds = array<i64: 1, 8>}, {pipeline_mode = #tpu.pipeline_mode<synchronous>, transform_indices = @transform_6, window_bounds = array<i64: 1, 8>}, {pipeline_mode = #tpu.pipeline_mode<synchronous>, transform_indices = @transform_7, window_bounds = array<i64: 1, 8>}, {pipeline_mode = #tpu.pipeline_mode<synchronous>, transform_indices = @transform_8, window_bounds = array<i64: 1, 8>}, {pipeline_mode = #tpu.pipeline_mode<synchronous>, transform_indices = @transform_9, window_bounds = array<i64: 64, 128>}, {pipeline_mode = #tpu.pipeline_mode<synchronous>, transform_indices = @transform_10, window_bounds = array<i64: 1, 8>}, {pipeline_mode = #tpu.pipeline_mode<synchronous>, transform_indices = @transform_11, window_bounds = array<i64: 1, 8>}, {pipeline_mode = #tpu.pipeline_mode<synchronous>, transform_indices = @transform_12, window_bounds = array<i64: 32, 128>}]} {
    %cst = arith.constant 1.000000e+00 : f32
    %0 = vector.broadcast %cst : f32 to vector<1x32xf32>
    %c0 = arith.constant 0 : index
    %c0_0 = arith.constant 0 : index
    %1 = vector.load %arg4[%c0, %c0_0] : memref<128x8xf32, #tpu.memory_space<vmem>>, vector<128x8xf32>
    %c0_1 = arith.constant 0 : index
    %c0_2 = arith.constant 0 : index
    %2 = vector.load %arg5[%c0_1, %c0_2] : memref<8x128xf32, #tpu.memory_space<vmem>>, vector<8x128xf32>
    %c0_3 = arith.constant 0 : index
    %c1 = arith.constant 1 : index
    %c0_4 = arith.constant 0 : index
    %3 = vector.load %arg1[%c0_3, %c1, %c0_4] : memref<2x18x64xf32, #tpu.memory_space<vmem>>, vector<2x16x64xf32>
    %4 = vector.shape_cast %3 : vector<2x16x64xf32> to vector<32x64xf32>
    %c1_5 = arith.constant 1 : index
    %c0_6 = arith.constant 0 : index
    %c0_7 = arith.constant 0 : index
    %5 = vector.load %arg2[%c1_5, %c0_6, %c0_7] : memref<3x64x128xf32, #tpu.memory_space<vmem>>, vector<1x64x128xf32>
    %6 = vector.shape_cast %5 : vector<1x64x128xf32> to vector<64x128xf32>
    %cst_8 = arith.constant dense<0.000000e+00> : vector<32x128xf32>
    %7 = tpu.matmul %4, %6, %cst_8 {dimension_numbers = #tpu.dot_dimension_numbers<[1], [0], [0], [1], [0, 0, 1, 1], [], []>} : vector<32x64xf32>, vector<64x128xf32>, vector<32x128xf32> -> vector<32x128xf32>
    %c0_9 = arith.constant 0 : index
    %c0_10 = arith.constant 0 : index
    %c0_11 = arith.constant 0 : index
    %8 = vector.load %arg1[%c0_9, %c0_10, %c0_11] : memref<2x18x64xf32, #tpu.memory_space<vmem>>, vector<2x16x64xf32>
    %9 = vector.shape_cast %8 : vector<2x16x64xf32> to vector<32x64xf32>
    %c0_12 = arith.constant 0 : index
    %c0_13 = arith.constant 0 : index
    %c0_14 = arith.constant 0 : index
    %10 = vector.load %arg2[%c0_12, %c0_13, %c0_14] : memref<3x64x128xf32, #tpu.memory_space<vmem>>, vector<1x64x128xf32>
    %11 = vector.shape_cast %10 : vector<1x64x128xf32> to vector<64x128xf32>
    %cst_15 = arith.constant dense<0.000000e+00> : vector<32x128xf32>
    %12 = tpu.matmul %9, %11, %cst_15 {dimension_numbers = #tpu.dot_dimension_numbers<[1], [0], [0], [1], [0, 0, 1, 1], [], []>} : vector<32x64xf32>, vector<64x128xf32>, vector<32x128xf32> -> vector<32x128xf32>
    %13 = arith.addf %7, %12 : vector<32x128xf32>
    %c0_16 = arith.constant 0 : index
    %c2 = arith.constant 2 : index
    %c0_17 = arith.constant 0 : index
    %14 = vector.load %arg1[%c0_16, %c2, %c0_17] : memref<2x18x64xf32, #tpu.memory_space<vmem>>, vector<2x16x64xf32>
    %15 = vector.shape_cast %14 : vector<2x16x64xf32> to vector<32x64xf32>
    %c2_18 = arith.constant 2 : index
    %c0_19 = arith.constant 0 : index
    %c0_20 = arith.constant 0 : index
    %16 = vector.load %arg2[%c2_18, %c0_19, %c0_20] : memref<3x64x128xf32, #tpu.memory_space<vmem>>, vector<1x64x128xf32>
    %17 = vector.shape_cast %16 : vector<1x64x128xf32> to vector<64x128xf32>
    %cst_21 = arith.constant dense<0.000000e+00> : vector<32x128xf32>
    %18 = tpu.matmul %15, %17, %cst_21 {dimension_numbers = #tpu.dot_dimension_numbers<[1], [0], [0], [1], [0, 0, 1, 1], [], []>} : vector<32x64xf32>, vector<64x128xf32>, vector<32x128xf32> -> vector<32x128xf32>
    %19 = arith.addf %13, %18 : vector<32x128xf32>
    %cst_22 = arith.constant dense<0.000000e+00> : vector<1x128xf32>
    %20 = tpu.matmul %0, %19, %cst_22 {dimension_numbers = #tpu.dot_dimension_numbers<[1], [0], [0], [1], [0, 0, 1, 1], [], []>} : vector<1x32xf32>, vector<32x128xf32>, vector<1x128xf32> -> vector<1x128xf32>
    %21 = arith.mulf %19, %19 : vector<32x128xf32>
    %cst_23 = arith.constant dense<0.000000e+00> : vector<1x128xf32>
    %22 = tpu.matmul %0, %21, %cst_23 {dimension_numbers = #tpu.dot_dimension_numbers<[1], [0], [0], [1], [0, 0, 1, 1], [], []>} : vector<1x32xf32>, vector<32x128xf32>, vector<1x128xf32> -> vector<1x128xf32>
    %cst_24 = arith.constant dense<0.000000e+00> : vector<1x8xf32>
    %23 = tpu.matmul %20, %1, %cst_24 {dimension_numbers = #tpu.dot_dimension_numbers<[1], [0], [0], [1], [0, 0, 1, 1], [], []>} : vector<1x128xf32>, vector<128x8xf32>, vector<1x8xf32> -> vector<1x8xf32>
    %cst_25 = arith.constant 0.001953125 : f32
    %24 = vector.broadcast %cst_25 : f32 to vector<1x8xf32>
    %25 = arith.mulf %23, %24 : vector<1x8xf32>
    %cst_26 = arith.constant dense<0.000000e+00> : vector<1x8xf32>
    %26 = tpu.matmul %22, %1, %cst_26 {dimension_numbers = #tpu.dot_dimension_numbers<[1], [0], [0], [1], [0, 0, 1, 1], [], []>} : vector<1x128xf32>, vector<128x8xf32>, vector<1x8xf32> -> vector<1x8xf32>
    %cst_27 = arith.constant 0.001953125 : f32
    %27 = vector.broadcast %cst_27 : f32 to vector<1x8xf32>
    %28 = arith.mulf %26, %27 : vector<1x8xf32>
    %29 = arith.mulf %25, %25 : vector<1x8xf32>
    %30 = arith.subf %28, %29 : vector<1x8xf32>
    %cst_28 = arith.constant 9.99999974E-6 : f32
    %31 = vector.broadcast %cst_28 : f32 to vector<1x8xf32>
    %32 = arith.addf %30, %31 : vector<1x8xf32>
    %33 = math.rsqrt %32 : vector<1x8xf32>
    %c0_29 = arith.constant 0 : index
    %c0_30 = arith.constant 0 : index
    %34 = vector.load %arg6[%c0_29, %c0_30] : memref<1x8xf32, #tpu.memory_space<vmem>>, vector<1x8xf32>
    %35 = arith.mulf %34, %33 : vector<1x8xf32>
    %c0_31 = arith.constant 0 : index
    %c0_32 = arith.constant 0 : index
    %36 = vector.load %arg7[%c0_31, %c0_32] : memref<1x8xf32, #tpu.memory_space<vmem>>, vector<1x8xf32>
    %37 = arith.mulf %25, %35 : vector<1x8xf32>
    %38 = arith.subf %36, %37 : vector<1x8xf32>
    %cst_33 = arith.constant dense<0.000000e+00> : vector<1x128xf32>
    %39 = tpu.matmul %35, %2, %cst_33 {dimension_numbers = #tpu.dot_dimension_numbers<[1], [0], [0], [1], [0, 0, 1, 1], [], []>} : vector<1x8xf32>, vector<8x128xf32>, vector<1x128xf32> -> vector<1x128xf32>
    %cst_34 = arith.constant dense<0.000000e+00> : vector<1x128xf32>
    %40 = tpu.matmul %38, %2, %cst_34 {dimension_numbers = #tpu.dot_dimension_numbers<[1], [0], [0], [1], [0, 0, 1, 1], [], []>} : vector<1x8xf32>, vector<8x128xf32>, vector<1x128xf32> -> vector<1x128xf32>
    %41 = vector.broadcast %39 : vector<1x128xf32> to vector<32x128xf32>
    %42 = arith.mulf %19, %41 : vector<32x128xf32>
    %43 = vector.broadcast %40 : vector<1x128xf32> to vector<32x128xf32>
    %44 = arith.addf %42, %43 : vector<32x128xf32>
    %cst_35 = arith.constant 0.000000e+00 : f32
    %45 = vector.broadcast %cst_35 : f32 to vector<32x128xf32>
    %46 = arith.maximumf %44, %45 : vector<32x128xf32>
    %cst_36 = arith.constant 0.000000e+00 : f32
    %47 = vector.broadcast %cst_36 : f32 to vector<2x1x128xf32>
    %c0_37 = arith.constant 0 : index
    %c0_38 = arith.constant 0 : index
    %c0_39 = arith.constant 0 : index
    %48 = vector.load %arg14[%c0_37, %c0_38, %c0_39] : memref<2x18x128xf32, #tpu.memory_space<vmem>>, vector<2x1x128xf32>
    tpu.vector_store %arg14[%c0_37, %c0_38, %c0_39], %47 {strides = array<i32>} : memref<2x18x128xf32, #tpu.memory_space<vmem>>, vector<2x1x128xf32>,
    %cst_40 = arith.constant 0.000000e+00 : f32
    %49 = vector.broadcast %cst_40 : f32 to vector<2x1x128xf32>
    %c0_41 = arith.constant 0 : index
    %c17 = arith.constant 17 : index
    %c0_42 = arith.constant 0 : index
    %50 = vector.load %arg14[%c0_41, %c17, %c0_42] : memref<2x18x128xf32, #tpu.memory_space<vmem>>, vector<2x1x128xf32>
    tpu.vector_store %arg14[%c0_41, %c17, %c0_42], %49 {strides = array<i32>} : memref<2x18x128xf32, #tpu.memory_space<vmem>>, vector<2x1x128xf32>,
    %51 = vector.shape_cast %46 : vector<32x128xf32> to vector<2x16x128xf32>
    %c0_43 = arith.constant 0 : index
    %c1_44 = arith.constant 1 : index
    %c0_45 = arith.constant 0 : index
    %52 = vector.load %arg14[%c0_43, %c1_44, %c0_45] : memref<2x18x128xf32, #tpu.memory_space<vmem>>, vector<2x16x128xf32>
    tpu.vector_store %arg14[%c0_43, %c1_44, %c0_45], %51 {strides = array<i32>} : memref<2x18x128xf32, #tpu.memory_space<vmem>>, vector<2x16x128xf32>,
    %c0_46 = arith.constant 0 : index
    %c0_47 = arith.constant 0 : index
    %c0_48 = arith.constant 0 : index
    %53 = vector.load %arg14[%c0_46, %c0_47, %c0_48] : memref<2x18x128xf32, #tpu.memory_space<vmem>>, vector<2x16x128xf32>
    %54 = vector.shape_cast %53 : vector<2x16x128xf32> to vector<32x128xf32>
    %c0_49 = arith.constant 0 : index
    %c0_50 = arith.constant 0 : index
    %c0_51 = arith.constant 0 : index
    %55 = vector.load %arg3[%c0_49, %c0_50, %c0_51] : memref<3x128x128xf32, #tpu.memory_space<vmem>>, vector<1x128x128xf32>
    %56 = vector.shape_cast %55 : vector<1x128x128xf32> to vector<128x128xf32>
    %cst_52 = arith.constant dense<0.000000e+00> : vector<32x128xf32>
    %57 = tpu.matmul %54, %56, %cst_52 {dimension_numbers = #tpu.dot_dimension_numbers<[1], [0], [0], [1], [0, 0, 1, 1], [], []>} : vector<32x128xf32>, vector<128x128xf32>, vector<32x128xf32> -> vector<32x128xf32>
    %c0_53 = arith.constant 0 : index
    %c1_54 = arith.constant 1 : index
    %c0_55 = arith.constant 0 : index
    %58 = vector.load %arg14[%c0_53, %c1_54, %c0_55] : memref<2x18x128xf32, #tpu.memory_space<vmem>>, vector<2x16x128xf32>
    %59 = vector.shape_cast %58 : vector<2x16x128xf32> to vector<32x128xf32>
    %c1_56 = arith.constant 1 : index
    %c0_57 = arith.constant 0 : index
    %c0_58 = arith.constant 0 : index
    %60 = vector.load %arg3[%c1_56, %c0_57, %c0_58] : memref<3x128x128xf32, #tpu.memory_space<vmem>>, vector<1x128x128xf32>
    %61 = vector.shape_cast %60 : vector<1x128x128xf32> to vector<128x128xf32>
    %cst_59 = arith.constant dense<0.000000e+00> : vector<32x128xf32>
    %62 = tpu.matmul %59, %61, %cst_59 {dimension_numbers = #tpu.dot_dimension_numbers<[1], [0], [0], [1], [0, 0, 1, 1], [], []>} : vector<32x128xf32>, vector<128x128xf32>, vector<32x128xf32> -> vector<32x128xf32>
    %63 = arith.addf %57, %62 : vector<32x128xf32>
    %c0_60 = arith.constant 0 : index
    %c2_61 = arith.constant 2 : index
    %c0_62 = arith.constant 0 : index
    %64 = vector.load %arg14[%c0_60, %c2_61, %c0_62] : memref<2x18x128xf32, #tpu.memory_space<vmem>>, vector<2x16x128xf32>
    %65 = vector.shape_cast %64 : vector<2x16x128xf32> to vector<32x128xf32>
    %c2_63 = arith.constant 2 : index
    %c0_64 = arith.constant 0 : index
    %c0_65 = arith.constant 0 : index
    %66 = vector.load %arg3[%c2_63, %c0_64, %c0_65] : memref<3x128x128xf32, #tpu.memory_space<vmem>>, vector<1x128x128xf32>
    %67 = vector.shape_cast %66 : vector<1x128x128xf32> to vector<128x128xf32>
    %cst_66 = arith.constant dense<0.000000e+00> : vector<32x128xf32>
    %68 = tpu.matmul %65, %67, %cst_66 {dimension_numbers = #tpu.dot_dimension_numbers<[1], [0], [0], [1], [0, 0, 1, 1], [], []>} : vector<32x128xf32>, vector<128x128xf32>, vector<32x128xf32> -> vector<32x128xf32>
    %69 = arith.addf %63, %68 : vector<32x128xf32>
    %cst_67 = arith.constant dense<0.000000e+00> : vector<1x128xf32>
    %70 = tpu.matmul %0, %69, %cst_67 {dimension_numbers = #tpu.dot_dimension_numbers<[1], [0], [0], [1], [0, 0, 1, 1], [], []>} : vector<1x32xf32>, vector<32x128xf32>, vector<1x128xf32> -> vector<1x128xf32>
    %71 = arith.mulf %69, %69 : vector<32x128xf32>
    %cst_68 = arith.constant dense<0.000000e+00> : vector<1x128xf32>
    %72 = tpu.matmul %0, %71, %cst_68 {dimension_numbers = #tpu.dot_dimension_numbers<[1], [0], [0], [1], [0, 0, 1, 1], [], []>} : vector<1x32xf32>, vector<32x128xf32>, vector<1x128xf32> -> vector<1x128xf32>
    %cst_69 = arith.constant dense<0.000000e+00> : vector<1x8xf32>
    %73 = tpu.matmul %70, %1, %cst_69 {dimension_numbers = #tpu.dot_dimension_numbers<[1], [0], [0], [1], [0, 0, 1, 1], [], []>} : vector<1x128xf32>, vector<128x8xf32>, vector<1x8xf32> -> vector<1x8xf32>
    %cst_70 = arith.constant 0.001953125 : f32
    %74 = vector.broadcast %cst_70 : f32 to vector<1x8xf32>
    %75 = arith.mulf %73, %74 : vector<1x8xf32>
    %cst_71 = arith.constant dense<0.000000e+00> : vector<1x8xf32>
    %76 = tpu.matmul %72, %1, %cst_71 {dimension_numbers = #tpu.dot_dimension_numbers<[1], [0], [0], [1], [0, 0, 1, 1], [], []>} : vector<1x128xf32>, vector<128x8xf32>, vector<1x8xf32> -> vector<1x8xf32>
    %cst_72 = arith.constant 0.001953125 : f32
    %77 = vector.broadcast %cst_72 : f32 to vector<1x8xf32>
    %78 = arith.mulf %76, %77 : vector<1x8xf32>
    %79 = arith.mulf %75, %75 : vector<1x8xf32>
    %80 = arith.subf %78, %79 : vector<1x8xf32>
    %cst_73 = arith.constant 9.99999974E-6 : f32
    %81 = vector.broadcast %cst_73 : f32 to vector<1x8xf32>
    %82 = arith.addf %80, %81 : vector<1x8xf32>
    %83 = math.rsqrt %82 : vector<1x8xf32>
    %c0_74 = arith.constant 0 : index
    %c0_75 = arith.constant 0 : index
    %84 = vector.load %arg8[%c0_74, %c0_75] : memref<1x8xf32, #tpu.memory_space<vmem>>, vector<1x8xf32>
    %85 = arith.mulf %84, %83 : vector<1x8xf32>
    %c0_76 = arith.constant 0 : index
    %c0_77 = arith.constant 0 : index
    %86 = vector.load %arg9[%c0_76, %c0_77] : memref<1x8xf32, #tpu.memory_space<vmem>>, vector<1x8xf32>
    %87 = arith.mulf %75, %85 : vector<1x8xf32>
    %88 = arith.subf %86, %87 : vector<1x8xf32>
    %cst_78 = arith.constant dense<0.000000e+00> : vector<1x128xf32>
    %89 = tpu.matmul %85, %2, %cst_78 {dimension_numbers = #tpu.dot_dimension_numbers<[1], [0], [0], [1], [0, 0, 1, 1], [], []>} : vector<1x8xf32>, vector<8x128xf32>, vector<1x128xf32> -> vector<1x128xf32>
    %cst_79 = arith.constant dense<0.000000e+00> : vector<1x128xf32>
    %90 = tpu.matmul %88, %2, %cst_79 {dimension_numbers = #tpu.dot_dimension_numbers<[1], [0], [0], [1], [0, 0, 1, 1], [], []>} : vector<1x8xf32>, vector<8x128xf32>, vector<1x128xf32> -> vector<1x128xf32>
    %91 = vector.broadcast %89 : vector<1x128xf32> to vector<32x128xf32>
    %92 = arith.mulf %69, %91 : vector<32x128xf32>
    %93 = vector.broadcast %90 : vector<1x128xf32> to vector<32x128xf32>
    %94 = arith.addf %92, %93 : vector<32x128xf32>
    %c0_80 = arith.constant 0 : index
    %c0_81 = arith.constant 0 : index
    %95 = vector.load %arg10[%c0_80, %c0_81] : memref<64x128xf32, #tpu.memory_space<vmem>>, vector<64x128xf32>
    %cst_82 = arith.constant dense<0.000000e+00> : vector<32x128xf32>
    %96 = tpu.matmul %4, %95, %cst_82 {dimension_numbers = #tpu.dot_dimension_numbers<[1], [0], [0], [1], [0, 0, 1, 1], [], []>} : vector<32x64xf32>, vector<64x128xf32>, vector<32x128xf32> -> vector<32x128xf32>
    %cst_83 = arith.constant dense<0.000000e+00> : vector<1x128xf32>
    %97 = tpu.matmul %0, %96, %cst_83 {dimension_numbers = #tpu.dot_dimension_numbers<[1], [0], [0], [1], [0, 0, 1, 1], [], []>} : vector<1x32xf32>, vector<32x128xf32>, vector<1x128xf32> -> vector<1x128xf32>
    %98 = arith.mulf %96, %96 : vector<32x128xf32>
    %cst_84 = arith.constant dense<0.000000e+00> : vector<1x128xf32>
    %99 = tpu.matmul %0, %98, %cst_84 {dimension_numbers = #tpu.dot_dimension_numbers<[1], [0], [0], [1], [0, 0, 1, 1], [], []>} : vector<1x32xf32>, vector<32x128xf32>, vector<1x128xf32> -> vector<1x128xf32>
    %cst_85 = arith.constant dense<0.000000e+00> : vector<1x8xf32>
    %100 = tpu.matmul %97, %1, %cst_85 {dimension_numbers = #tpu.dot_dimension_numbers<[1], [0], [0], [1], [0, 0, 1, 1], [], []>} : vector<1x128xf32>, vector<128x8xf32>, vector<1x8xf32> -> vector<1x8xf32>
    %cst_86 = arith.constant 0.001953125 : f32
    %101 = vector.broadcast %cst_86 : f32 to vector<1x8xf32>
    %102 = arith.mulf %100, %101 : vector<1x8xf32>
    %cst_87 = arith.constant dense<0.000000e+00> : vector<1x8xf32>
    %103 = tpu.matmul %99, %1, %cst_87 {dimension_numbers = #tpu.dot_dimension_numbers<[1], [0], [0], [1], [0, 0, 1, 1], [], []>} : vector<1x128xf32>, vector<128x8xf32>, vector<1x8xf32> -> vector<1x8xf32>
    %cst_88 = arith.constant 0.001953125 : f32
    %104 = vector.broadcast %cst_88 : f32 to vector<1x8xf32>
    %105 = arith.mulf %103, %104 : vector<1x8xf32>
    %106 = arith.mulf %102, %102 : vector<1x8xf32>
    %107 = arith.subf %105, %106 : vector<1x8xf32>
    %cst_89 = arith.constant 9.99999974E-6 : f32
    %108 = vector.broadcast %cst_89 : f32 to vector<1x8xf32>
    %109 = arith.addf %107, %108 : vector<1x8xf32>
    %110 = math.rsqrt %109 : vector<1x8xf32>
    %c0_90 = arith.constant 0 : index
    %c0_91 = arith.constant 0 : index
    %111 = vector.load %arg11[%c0_90, %c0_91] : memref<1x8xf32, #tpu.memory_space<vmem>>, vector<1x8xf32>
    %112 = arith.mulf %111, %110 : vector<1x8xf32>
    %c0_92 = arith.constant 0 : index
    %c0_93 = arith.constant 0 : index
    %113 = vector.load %arg12[%c0_92, %c0_93] : memref<1x8xf32, #tpu.memory_space<vmem>>, vector<1x8xf32>
    %114 = arith.mulf %102, %112 : vector<1x8xf32>
    %115 = arith.subf %113, %114 : vector<1x8xf32>
    %cst_94 = arith.constant dense<0.000000e+00> : vector<1x128xf32>
    %116 = tpu.matmul %112, %2, %cst_94 {dimension_numbers = #tpu.dot_dimension_numbers<[1], [0], [0], [1], [0, 0, 1, 1], [], []>} : vector<1x8xf32>, vector<8x128xf32>, vector<1x128xf32> -> vector<1x128xf32>
    %cst_95 = arith.constant dense<0.000000e+00> : vector<1x128xf32>
    %117 = tpu.matmul %115, %2, %cst_95 {dimension_numbers = #tpu.dot_dimension_numbers<[1], [0], [0], [1], [0, 0, 1, 1], [], []>} : vector<1x8xf32>, vector<8x128xf32>, vector<1x128xf32> -> vector<1x128xf32>
    %118 = vector.broadcast %116 : vector<1x128xf32> to vector<32x128xf32>
    %119 = arith.mulf %96, %118 : vector<32x128xf32>
    %120 = vector.broadcast %117 : vector<1x128xf32> to vector<32x128xf32>
    %121 = arith.addf %119, %120 : vector<32x128xf32>
    %122 = arith.addf %94, %121 : vector<32x128xf32>
    %cst_96 = arith.constant 0.000000e+00 : f32
    %123 = vector.broadcast %cst_96 : f32 to vector<32x128xf32>
    %124 = arith.maximumf %122, %123 : vector<32x128xf32>
    %c0_97 = arith.constant 0 : index
    %c0_98 = arith.constant 0 : index
    %125 = vector.load %arg13[%c0_97, %c0_98] : memref<32x128xf32, #tpu.memory_space<vmem>>, vector<32x128xf32>
    tpu.vector_store %arg13[%c0_97, %c0_98], %124 {strides = array<i32>} : memref<32x128xf32, #tpu.memory_space<vmem>>, vector<32x128xf32>,
    return
  }
  func.func @transform_0(%arg0: i32) -> (i32, i32, i32) {
    %c0_i32 = arith.constant 0 : i32
    %c0_i32_0 = arith.constant 0 : i32
    %c0_i32_1 = arith.constant 0 : i32
    %c0_i32_2 = arith.constant 0 : i32
    return %c0_i32, %c0_i32_0, %c0_i32_1 : i32, i32, i32
  }
  func.func @transform_1(%arg0: i32) -> (i32, i32, i32) {
    %c0_i32 = arith.constant 0 : i32
    %c0_i32_0 = arith.constant 0 : i32
    %c0_i32_1 = arith.constant 0 : i32
    %c0_i32_2 = arith.constant 0 : i32
    return %c0_i32, %c0_i32_0, %c0_i32_1 : i32, i32, i32
  }
  func.func @transform_2(%arg0: i32) -> (i32, i32, i32) {
    %c0_i32 = arith.constant 0 : i32
    %c0_i32_0 = arith.constant 0 : i32
    %c0_i32_1 = arith.constant 0 : i32
    %c0_i32_2 = arith.constant 0 : i32
    return %c0_i32, %c0_i32_0, %c0_i32_1 : i32, i32, i32
  }
  func.func @transform_3(%arg0: i32) -> (i32, i32) {
    %c0_i32 = arith.constant 0 : i32
    %c0_i32_0 = arith.constant 0 : i32
    %c0_i32_1 = arith.constant 0 : i32
    return %c0_i32, %c0_i32_0 : i32, i32
  }
  func.func @transform_4(%arg0: i32) -> (i32, i32) {
    %c0_i32 = arith.constant 0 : i32
    %c0_i32_0 = arith.constant 0 : i32
    %c0_i32_1 = arith.constant 0 : i32
    return %c0_i32, %c0_i32_0 : i32, i32
  }
  func.func @transform_5(%arg0: i32) -> (i32, i32) {
    %c0_i32 = arith.constant 0 : i32
    %c0_i32_0 = arith.constant 0 : i32
    %c0_i32_1 = arith.constant 0 : i32
    return %c0_i32, %c0_i32_0 : i32, i32
  }
  func.func @transform_6(%arg0: i32) -> (i32, i32) {
    %c0_i32 = arith.constant 0 : i32
    %c0_i32_0 = arith.constant 0 : i32
    %c0_i32_1 = arith.constant 0 : i32
    return %c0_i32, %c0_i32_0 : i32, i32
  }
  func.func @transform_7(%arg0: i32) -> (i32, i32) {
    %c0_i32 = arith.constant 0 : i32
    %c0_i32_0 = arith.constant 0 : i32
    %c0_i32_1 = arith.constant 0 : i32
    return %c0_i32, %c0_i32_0 : i32, i32
  }
  func.func @transform_8(%arg0: i32) -> (i32, i32) {
    %c0_i32 = arith.constant 0 : i32
    %c0_i32_0 = arith.constant 0 : i32
    %c0_i32_1 = arith.constant 0 : i32
    return %c0_i32, %c0_i32_0 : i32, i32
  }
  func.func @transform_9(%arg0: i32) -> (i32, i32) {
    %c0_i32 = arith.constant 0 : i32
    %c0_i32_0 = arith.constant 0 : i32
    %c0_i32_1 = arith.constant 0 : i32
    return %c0_i32, %c0_i32_0 : i32, i32
  }
  func.func @transform_10(%arg0: i32) -> (i32, i32) {
    %c0_i32 = arith.constant 0 : i32
    %c0_i32_0 = arith.constant 0 : i32
    %c0_i32_1 = arith.constant 0 : i32
    return %c0_i32, %c0_i32_0 : i32, i32
  }
  func.func @transform_11(%arg0: i32) -> (i32, i32) {
    %c0_i32 = arith.constant 0 : i32
    %c0_i32_0 = arith.constant 0 : i32
    %c0_i32_1 = arith.constant 0 : i32
    return %c0_i32, %c0_i32_0 : i32, i32
  }
  func.func @transform_12(%arg0: i32) -> (i32, i32) {
    %c0_i32 = arith.constant 0 : i32
    %c0_i32_0 = arith.constant 0 : i32
    %c0_i32_1 = arith.constant 0 : i32
    return %c0_i32, %c0_i32_0 : i32, i32
  }
}

</mosaic_0001>

<bundles_post_ra>
// kernel: tpu_custom_call.1
= control target key start
LH: loop header
LB: loop body
LE: loop exit
PB: predicated region body
PF: predicated region fallthrough
CT: control target
= control target key end

     0   :  { %17 = vsyncpa [#allocation4], 0  ;;  %s1636_s0 = inlined_call_operand.vmem [shape: f32[2,18,64], index: 0, kind: input, shape index: {}]   ;;  %s1637_s1 = inlined_call_operand.vmem [shape: f32[3,64,128], index: 1, kind: input, shape index: {}]   ;;  %s1638_s2 = inlined_call_operand.hbm [shape: f32[3,128,128], index: 2, kind: input, shape index: {}]   ;;  %s1639_s3 = inlined_call_operand.vmem [shape: f32[128,8], index: 3, kind: input, shape index: {}]   ;;  %s1640_s4 = inlined_call_operand.vmem [shape: f32[8,128], index: 4, kind: input, shape index: {}]   ;;  %s1641_s5 = inlined_call_operand.vmem [shape: f32[1,8], index: 5, kind: input, shape index: {}]   ;;  %s1642_s6 = inlined_call_operand.vmem [shape: f32[1,8], index: 6, kind: input, shape index: {}]   ;;  %s1643_s7 = inlined_call_operand.vmem [shape: f32[1,8], index: 7, kind: input, shape index: {}]   ;;  %s1644_s8 = inlined_call_operand.vmem [shape: f32[1,8], index: 8, kind: input, shape index: {}]   ;;  %s1645_s9 = inlined_call_operand.hbm [shape: f32[64,128], index: 9, kind: input, shape index: {}]   ;;  %s1646_s10 = inlined_call_operand.vmem [shape: f32[1,8], index: 10, kind: input, shape index: {}]   ;;  %s1647_s11 = inlined_call_operand.vmem [shape: f32[1,8], index: 11, kind: input, shape index: {}]   ;;  %s1648_s12 = inlined_call_operand.hbm [shape: f32[32,128], index: 12, kind: output, shape index: {}]  }
   0x1   :  { %18 = vsyncpa [#allocation7], 0 }
   0x2   :  { %19 = vsyncpa [#allocation5], 0  ;;  %s28_s23 = sshll.u32 %s1638_s2, 4  ;;  %s1111_s24 = smov [#allocation3]   ;;  %s29_s23 = int_to_ptr.hbm [resolvable:$true] %s28_s23 }
   0x3   :  { %s30_s25 = sshll.u32 %s1111_s24, 4  ;;  %s53_s28 = sshll.u32 %s1645_s9, 4  ;;  %s31_s25 = int_to_ptr.vmem [resolvable:$true] %s30_s25  ;;  %s54_s28 = int_to_ptr.hbm [resolvable:$true] %s53_s28 }
   0x4   :  { %s1112_s29 = smov 128   ;;  %s1113_s30 = smov 8  }
   0x5   :  { %36 = dma.hbm_to_vmem [thread:$0]  %s29_s23, 6144, %s31_s25, [#allocation4], %s1112_s29, %s1112_s29, %s1113_s30  }
   0x6   :  { %s1114_s13 = smov [#allocation6]  }
   0x7   :  { %s55_s14 = sshll.u32 %s1114_s13, 4  ;;  %s56_s14 = int_to_ptr.vmem [resolvable:$true] %s55_s14 }
   0x8   :  { %61 = dma.hbm_to_vmem [thread:$0]  %s54_s28, 1024, %s56_s14, [#allocation7], %s1112_s29, %s1112_s29, %s1113_s30  }
   0x9   :  { %1105 = dma.done.wait [#allocation4], 6144  }
   0xa   :  { %1106 = vsyncadd [#allocation4], 4294961152 }
   0xb   :  { %1107 = dma.done.wait [#allocation7], 1024  }
   0xc   :  { %1108 = vsyncadd [#allocation7], 4294966272  ;;  %v999_v0 = vld [vmem:[%s1637_s1 + $0xb8] sm:$0xff]  ;;  %v998_v1 = vld [vmem:[%s1637_s1 + $0xb0] sm:$0xff]  ;;  %vm116_vm0 = vcmask 523264   ;;  %vm257_vm1 = vcmask 261120  }
   0xd   :  { %v115_v2 = vld [vmem:[%s1637_s1 + $0x38] sm:$0xff]  ;;  %232 = vmatpush.msra.mxu2 %v999_v0  ;;  %v114_v4 = vld [vmem:[%s1637_s1 + $0x30] sm:$0xff]  ;;  %v997_v5 = vld [vmem:[%s1637_s1 + $0xa8] sm:$0xff]  ;;  %vm365_vm5 = vcmask 64512  }
   0xe   :  { %137 = vmatpush.msra.mxu0 %v115_v2  ;;  %v983_v3 = vld [vmem:[%s1637_s1 + $0x78] sm:$0xff]  ;;  %v982_v6 = vld [vmem:[%s1637_s1 + $0x70] sm:$0xff]  ;;  %v113_v7 = vld [vmem:[%s1637_s1 + $0x28] sm:$0xff] }
   0xf   :  { %178 = vmatpush.msra.mxu1 %v983_v3  ;;  %233 = vmatpush.msra.mxu2 %v998_v1  ;;  %v981_v8 = vld [vmem:[%s1637_s1 + $0x68] sm:$0xff]  ;;  %v996_v9 = vld [vmem:[%s1637_s1 + $0xa0] sm:$0xff]  ;;  %v995_v12 = vld [vmem:[%s1637_s1 + $0x98] sm:$0xff] }
  0x10   :  { %138 = vmatpush.msra.mxu0 %v114_v4  ;;  %v112_v10 = vld [vmem:[%s1637_s1 + $0x20] sm:$0xff]  ;;  %v111_v13 = vld [vmem:[%s1637_s1 + $0x18] sm:$0xff]  ;;  %v994_v15 = vld [vmem:[%s1637_s1 + $0x90] sm:$0xff] }
  0x11   :  { %179 = vmatpush.msra.mxu1 %v982_v6  ;;  %234 = vmatpush.msra.mxu2 %v997_v5  ;;  %v980_v11 = vld [vmem:[%s1637_s1 + $0x60] sm:$0xff]  ;;  %v979_v14 = vld [vmem:[%s1637_s1 + $0x58] sm:$0xff]  ;;  %v110_v16 = vld [vmem:[%s1637_s1 + $0x10] sm:$0xff]  ;;  %v1115_v6 = vmov 1.0  }
  0x12   :  { %139 = vmatpush.msra.mxu0 %v113_v7  ;;  %v978_v17 = vld [vmem:[%s1637_s1 + $0x50] sm:$0xff]  ;;  %v993_v18 = vld [vmem:[%s1637_s1 + $0x88] sm:$0xff]  ;;  %v992_v21 = vld [vmem:[%s1637_s1 + $0x80] sm:$0xff] }
  0x13   :  { %180 = vmatpush.msra.mxu1 %v981_v8  ;;  %235 = vmatpush.msra.mxu2 %v996_v9  ;;  %v109_v19 = vld [vmem:[%s1637_s1 + $0x8] sm:$0xff]  ;;  %v108_v22 = vld [vmem:[%s1637_s1] sm:$0xff]  ;;  %v106_v31 = vld [vmem:[%s1636_s0 + $0x18] sm:$0xff] }
  0x14   :  { %140 = vmatpush.msra.mxu0 %v112_v10  ;;  %v977_v20 = vld [vmem:[%s1637_s1 + $0x48] sm:$0xff]  ;;  %v976_v24 = vld [vmem:[%s1637_s1 + $0x40] sm:$0xff]  ;;  %v1330_v42 = vld [vmem:[%s1639_s3 + $0x78] sm:$0xff] }
  0x15   :  { %181 = vmatpush.msra.mxu1 %v980_v11  ;;  %236 = vmatpush.msra.mxu2 %v995_v12  ;;  %v199_v23 = vld [vmem:[%s1636_s0 + $0x2] sm:$0xff]  ;;  %v200_v27 = vld [vmem:[%s1636_s0 + $0xa] sm:$0xff]  ;;  %v201_v30 = vld [vmem:[%s1636_s0 + $0x1a] sm:$0xff] }
  0x16   :  { %141 = vmatpush.msra.mxu0 %v111_v13  ;;  %v104_v25 = vld [vmem:[%s1636_s0] sm:$0xff]  ;;  %v105_v28 = vld [vmem:[%s1636_s0 + $0x8] sm:$0xff]  ;;  %v1335_v43 = vld [vmem:[%s1639_s3 + $0x70] sm:$0xff] }
  0x17   :  { %182 = vmatpush.msra.mxu1 %v979_v14  ;;  %237 = vmatpush.msra.mxu2 %v994_v15  ;;  %v1276_v26 = vld [vmem:[%s1636_s0 + $0x1] sm:$0xff]  ;;  %v1291_v29 = vld [vmem:[%s1636_s0 + $0x9] sm:$0xff]  ;;  %v1306_v32 = vld [vmem:[%s1636_s0 + $0x19] sm:$0xff] }
  0x18   :  { %142 = vmatpush.msra.mxu0 %v110_v16  ;;  %v202_v33 = vld [vmem:[%s1636_s0 + $0x22] sm:$0xff]  ;;  %v1356_v49 = vld [vmem:[%s1639_s3 + $0x58] sm:$0xff]  ;;  %v1363_v50 = vld [vmem:[%s1639_s3 + $0x50] sm:$0xff] }
  0x19   :  { %183 = vmatpush.msra.mxu1 %v978_v17  ;;  %238 = vmatpush.msra.mxu2 %v993_v18  ;;  %v107_v34 = vld [vmem:[%s1636_s0 + $0x20] sm:$0xff]  ;;  %v1342_v46 = vld [vmem:[%s1639_s3 + $0x68] sm:$0xff]  ;;  %v1384_v58 = vld [vmem:[%s1639_s3 + $0x38] sm:$0xff] }
  0x1a   :  { %143 = vmatpush.msra.mxu0 %v109_v19  ;;  %v1321_v35 = vld [vmem:[%s1636_s0 + $0x21] sm:$0xff]  ;;  %v1393_v61 = vld [vmem:[%s1639_s3 + $0x30] sm:$0xff]  ;;  %v1422_v4 = vld [vmem:[%s1639_s3 + $0x18] sm:$0xff]  ;;  %s962_s0 = sshll.u32 %s1648_s12, 4  ;;  %s963_s0 = int_to_ptr.hbm [resolvable:$true] %s962_s0 }
  0x1b   :  { %184 = vmatpush.msra.mxu1 %v977_v20  ;;  %239 = vmatpush.msra.mxu2 %v992_v21  ;;  %v1349_v47 = vld [vmem:[%s1639_s3 + $0x60] sm:$0xff]  ;;  %v1370_v53 = vld [vmem:[%s1639_s3 + $0x48] sm:$0xff]  ;;  %v1434_v7 = vld [vmem:[%s1639_s3 + $0x10] sm:$0xff] }
  0x1c   :  { %144 = vmatpush.msra.mxu0 %v108_v22  ;;  %1000 = vmatmul.msk.f32.vlgmr.msra.gmra.mxu2 %vm116_vm0, %v199_v23  ;;  %v1377_v55 = vld [vmem:[%s1639_s3 + $0x40] sm:$0xff]  ;;  %v1402_v0 = vld [vmem:[%s1639_s3 + $0x28] sm:$0xff] }
  0x1d   :  { %185 = vmatpush.msra.mxu1 %v976_v24  ;;  %984 = vmatmul.msk.f32.vlgmr.msra.gmra.mxu0 %vm116_vm0, %v104_v25  ;;  %v1412_v2 = vld [vmem:[%s1639_s3 + $0x20] sm:$0xff]  ;;  %v1443_v9 = vld [vmem:[%s1639_s3 + $0x8] sm:$0xff] }
  0x1e   :  { %988 = vmatmul.msk.f32.vlgmr.msra.gmra.mxu1 %vm116_vm0, %v1276_v26  ;;  %305 = vmatpush.msrb.mxu0 %v1330_v42  ;;  %v1459_v12 = vld [vmem:[%s1639_s3] sm:$0xff]  ;;  %v474_v18 = vld [vmem:[#allocation3 + $0xf8] sm:$0xff] }
  0x1f   :  { %326 = vmatpush.msrb.mxu1 %v1330_v42  ;;  %v1466_v16 = vld [vmem:[%s1640_s4] sm:$0xff]  ;;  %v453_v19 = vld [vmem:[#allocation3 + $0x78] sm:$0xff]  ;;  %475 = vmatpush.msrb.mxu2 %v474_v18  ;;  %v547_v18 = vld [vmem:[#allocation3 + $0x148] sm:$0xff] }
  0x20   :  { %306 = vmatpush.msrb.mxu0 %v1335_v43  ;;  %v553_v20 = vld [vmem:[#allocation3 + $0x178] sm:$0xff]  ;;  %v473_v22 = vld [vmem:[#allocation3 + $0xf0] sm:$0xff] }
  0x21   :  { %327 = vmatpush.msrb.mxu1 %v1335_v43  ;;  %v452_v23 = vld [vmem:[#allocation3 + $0x70] sm:$0xff]  ;;  %476 = vmatpush.msrb.mxu2 %v473_v22 }
  0x22   :  { %307 = vmatpush.msrb.mxu0 %v1342_v46  ;;  %v552_v24 = vld [vmem:[#allocation3 + $0x170] sm:$0xff] }
  0x23   :  { %328 = vmatpush.msrb.mxu1 %v1342_v46  ;;  %v465_v22 = vld [vmem:[#allocation3 + $0xb0] sm:$0xff] }
  0x24   :  { %1001 = vmatmul.msk.f32.gmra.mxu2 %vm116_vm0, %v200_v27  ;;  %308 = vmatpush.msrb.mxu0 %v1349_v47 }
  0x25   :  { %985 = vmatmul.msk.f32.gmra.mxu0 %vm116_vm0, %v105_v28  ;;  %329 = vmatpush.msrb.mxu1 %v1349_v47  ;;  %v472_v28 = vld [vmem:[#allocation3 + $0xe8] sm:$0xff] }
  0x26   :  { %989 = vmatmul.msk.f32.gmra.mxu1 %vm116_vm0, %v1291_v29  ;;  %309 = vmatpush.msrb.mxu0 %v1356_v49 }
  0x27   :  { %330 = vmatpush.msrb.mxu1 %v1356_v49  ;;  %477 = vmatpush.msrb.mxu2 %v472_v28  ;;  %v462_v28 = vld [vmem:[#allocation3 + $0x98] sm:$0xff] }
  0x28   :  { %310 = vmatpush.msrb.mxu0 %v1363_v50 }
  0x29   :  { %331 = vmatpush.msrb.mxu1 %v1363_v50 }
  0x2a   :  { %311 = vmatpush.msrb.mxu0 %v1370_v53 }
  0x2b   :  { %332 = vmatpush.msrb.mxu1 %v1370_v53 }
  0x2c   :  { %1002 = vmatmul.msk.f32.gmra.mxu2 %vm116_vm0, %v201_v30  ;;  %312 = vmatpush.msrb.mxu0 %v1377_v55  ;;  %v451_v30 = vld [vmem:[#allocation3 + $0x68] sm:$0xff] }
  0x2d   :  { %986 = vmatmul.msk.f32.gmra.mxu0 %vm116_vm0, %v106_v31  ;;  %333 = vmatpush.msrb.mxu1 %v1377_v55  ;;  %v551_v31 = vld [vmem:[#allocation3 + $0x168] sm:$0xff] }
  0x2e   :  { %990 = vmatmul.msk.f32.gmra.mxu1 %vm116_vm0, %v1306_v32  ;;  %313 = vmatpush.msrb.mxu0 %v1384_v58 }
  0x2f   :  { %334 = vmatpush.msrb.mxu1 %v1384_v58 }
  0x30   :  { %314 = vmatpush.msrb.mxu0 %v1393_v61 }
  0x31   :  { %335 = vmatpush.msrb.mxu1 %v1393_v61 }
  0x32   :  { %315 = vmatpush.msrb.mxu0 %v1402_v0 }
  0x33   :  { %336 = vmatpush.msrb.mxu1 %v1402_v0 }
  0x34   :  { %1003 = vmatmul.msk.f32.gmra.mxu2 %vm116_vm0, %v202_v33  ;;  %316 = vmatpush.msrb.mxu0 %v1412_v2 }
  0x35   :  { %987 = vmatmul.msk.f32.gmra.mxu0 %vm116_vm0, %v107_v34  ;;  %337 = vmatpush.msrb.mxu1 %v1412_v2 }
  0x36   :  { %991 = vmatmul.msk.f32.gmra.mxu1 %vm116_vm0, %v1321_v35  ;;  %317 = vmatpush.msrb.mxu0 %v1422_v4 }
  0x37   :  { %338 = vmatpush.msrb.mxu1 %v1422_v4 }
  0x38   :  { %318 = vmatpush.msrb.mxu0 %v1434_v7 }
  0x39   :  { %339 = vmatpush.msrb.mxu1 %v1434_v7 }
  0x3a   :  { %319 = vmatpush.msrb.mxu0 %v1443_v9 }
  0x3b   :  { %340 = vmatpush.msrb.mxu1 %v1443_v9 }
  0x3c   :  { %320 = vmatpush.msrb.mxu0 %v1459_v12 }
  0x3d   :  { %341 = vmatpush.msrb.mxu1 %v1459_v12 }
  0x3e   :  { %384 = vmatpush.msra.mxu0 %v1466_v16 }
  0x9a   :  { %v146_v36 = vpop.f32.mrf.mxu0 }
  0x9b   :  { %v187_v37 = vpop.f32.mrf.mxu1 }
  0x9c   :  { %v188_v62 = vadd.f32 %v187_v37, %v146_v36 }
  0x9f   :  { %v241_v38 = vpop.f32.mrf.mxu2 }
  0xa0   :  { %v1415_v3 = vadd.f32 %v241_v38, %v188_v62  ;;  %v468_v62 = vld [vmem:[#allocation3 + $0xc8] sm:$0xff] }
  0xa2   :  { %v149_v39 = vpop.f32.mrf.mxu0  ;;  %v281_v11 = vmul.f32 %v1415_v3, %v1415_v3 }
  0xa3   :  { %v190_v40 = vpop.f32.mrf.mxu1 }
  0xa4   :  { %v191_v59 = vadd.f32 %v190_v40, %v149_v39 }
  0xa7   :  { %v244_v41 = vpop.f32.mrf.mxu2 }
  0xa8   :  { %v1405_v1 = vadd.f32 %v244_v41, %v191_v59  ;;  %v469_v59 = vld [vmem:[#allocation3 + $0xd0] sm:$0xff] }
  0xaa   :  { %v152_v44 = vpop.f32.mrf.mxu0  ;;  %v282_v10 = vmul.f32 %v1405_v1, %v1405_v1 }
  0xab   :  { %v193_v45 = vpop.f32.mrf.mxu1 }
  0xac   :  { %v194_v56 = vadd.f32 %v193_v45, %v152_v44  ;;  %v360_v44 = vld [vmem:[%s1641_s5] sm:$0x1] }
  0xaf   :  { %v247_v48 = vpop.f32.mrf.mxu2 }
  0xb0   :  { %v1395_v63 = vadd.f32 %v247_v48, %v194_v56  ;;  %v471_v56 = vld [vmem:[#allocation3 + $0xe0] sm:$0xff] }
  0xb1   :  { %478 = vmatpush.msrb.mxu2 %v471_v56  ;;  %v438_v56 = vld [vmem:[#allocation3] sm:$0xff] }
  0xb2   :  { %v155_v51 = vpop.f32.mrf.mxu0  ;;  %v283_v8 = vmul.f32 %v1395_v63, %v1395_v63 }
  0xb3   :  { %v196_v52 = vpop.f32.mrf.mxu1 }
  0xb4   :  { %v197_v54 = vadd.f32 %v196_v52, %v155_v51  ;;  %v362_v51 = vld [vmem:[%s1642_s6] sm:$0x1] }
  0xb7   :  { %v250_v57 = vpop.f32.mrf.mxu2 }
  0xb8   :  { %v1386_v60 = vadd.f32 %v250_v57, %v197_v54  ;;  %v470_v57 = vld [vmem:[#allocation3 + $0xd8] sm:$0xff] }
  0xb9   :  { %479 = vmatpush.msrb.mxu2 %v470_v57  ;;  %v538_v57 = vld [vmem:[#allocation3 + $0x100] sm:$0xff] }
  0xba   :  { %273 = vmatpush.msra.mxu3 %v1386_v60  ;;  %v284_v5 = vmul.f32 %v1386_v60, %v1386_v60 }
  0xbb   :  { %480 = vmatpush.msrb.mxu2 %v469_v59 }
  0xbc   :  { %274 = vmatpush.msra.mxu3 %v1395_v63 }
  0xbd   :  { %481 = vmatpush.msrb.mxu2 %v468_v62 }
  0xbe   :  { %275 = vmatpush.msra.mxu3 %v1405_v1 }
  0xc0   :  { %276 = vmatpush.msra.mxu3 %v1415_v3 }
  0xc1   :  { %1004 = vmatmul.msk.f32.vlgmr.msra.gmra.mxu3 %vm257_vm1, %v1115_v6 }
  0xc2   :  { %297 = vmatpush.msrb.mxu3 %v284_v5  ;;  %v450_v5 = vld [vmem:[#allocation3 + $0x60] sm:$0xff] }
  0xc4   :  { %298 = vmatpush.msrb.mxu3 %v283_v8  ;;  %v550_v8 = vld [vmem:[#allocation3 + $0x160] sm:$0xff] }
  0xc6   :  { %299 = vmatpush.msrb.mxu3 %v282_v10  ;;  %v467_v10 = vld [vmem:[#allocation3 + $0xc0] sm:$0xff] }
  0xc7   :  { %482 = vmatpush.msrb.mxu2 %v467_v10 }
  0xc8   :  { %300 = vmatpush.msrb.mxu3 %v281_v11  ;;  %v449_v11 = vld [vmem:[#allocation3 + $0x58] sm:$0xff] }
  0xc9   :  { %1005 = vmatmul.msk.f32.vlgmr.msrb.gmra.mxu3 %vm257_vm1, %v1115_v6 }
  0xca   :  { %407 = vmatpush.msra.mxu3 %v1466_v16 }
  0xcc   :  { %504 = vmatpush.msrb.mxu3 %v453_v19  ;;  %v466_v19 = vld [vmem:[#allocation3 + $0xb8] sm:$0xff] }
  0xcd   :  { %483 = vmatpush.msrb.mxu2 %v466_v19 }
  0xce   :  { %505 = vmatpush.msrb.mxu3 %v452_v23  ;;  %v464_v23 = vld [vmem:[#allocation3 + $0xa8] sm:$0xff] }
  0xcf   :  { %484 = vmatpush.msrb.mxu2 %v465_v22 }
  0xd0   :  { %506 = vmatpush.msrb.mxu3 %v451_v30  ;;  %v444_v30 = vld [vmem:[#allocation3 + $0x30] sm:$0xff] }
  0xd1   :  { %485 = vmatpush.msrb.mxu2 %v464_v23 }
  0xd2   :  { %507 = vmatpush.msrb.mxu3 %v450_v5 }
  0xd4   :  { %508 = vmatpush.msrb.mxu3 %v449_v11 }
 0x144   :  { %v278_v13 = vpop.f32.mrf.mxu3 }
 0x145   :  { %321 = vmatmul.f32.vlgmr.msrb.gmra.mxu0 %v278_v13  ;;  %v549_v13 = vld [vmem:[#allocation3 + $0x158] sm:$0xff] }
 0x146   :  { %554 = vmatpush.msrb.mxu0 %v553_v20  ;;  %v446_v20 = vld [vmem:[#allocation3 + $0x40] sm:$0xff] }
 0x148   :  { %555 = vmatpush.msrb.mxu0 %v552_v24  ;;  %v463_v24 = vld [vmem:[#allocation3 + $0xa0] sm:$0xff] }
 0x149   :  { %486 = vmatpush.msrb.mxu2 %v463_v24 }
 0x14a   :  { %556 = vmatpush.msrb.mxu0 %v551_v31  ;;  %v544_v31 = vld [vmem:[#allocation3 + $0x130] sm:$0xff] }
 0x14b   :  { %487 = vmatpush.msrb.mxu2 %v462_v28 }
 0x14c   :  { %v302_v14 = vpop.f32.mrf.mxu3  ;;  %557 = vmatpush.msrb.mxu0 %v550_v8 }
 0x14d   :  { %342 = vmatmul.f32.vlgmr.msrb.gmra.mxu1 %v302_v14  ;;  %v448_v14 = vld [vmem:[#allocation3 + $0x50] sm:$0xff] }
 0x14e   :  { %558 = vmatpush.msrb.mxu0 %v549_v13  ;;  %509 = vmatpush.msrb.mxu3 %v448_v14 }
 0x1c2   :  { %v322_v15 = vpop.f32.mrf.mxu0 }
 0x1c3   :  { %v325_v17 = vmul.f32 0.001953125, %v322_v15  ;;  %v548_v15 = vld [vmem:[#allocation3 + $0x150] sm:$0xff] }
 0x1c4   :  { %559 = vmatpush.msrb.mxu0 %v548_v15 }
 0x1c5   :  { %v347_v25 = vmul.f32 %v325_v17, %v325_v17 }
 0x1c6   :  { %560 = vmatpush.msrb.mxu0 %v547_v18 }
 0x1ca   :  { %v343_v21 = vpop.f32.mrf.mxu1 }
 0x1cb   :  { %v346_v27 = vmul.f32 0.001953125, %v343_v21  ;;  %v546_v21 = vld [vmem:[#allocation3 + $0x140] sm:$0xff] }
 0x1cc   :  { %561 = vmatpush.msrb.mxu0 %v546_v21 }
 0x1cd   :  { %v348_v33 = vsub.f32 %v346_v27, %v347_v25  ;;  %v445_v25 = vld [vmem:[#allocation3 + $0x38] sm:$0xff] }
 0x1ce   :  { %v545_v27 = vld [vmem:[#allocation3 + $0x138] sm:$0xff] }
 0x1cf   :  { %v349_v34 = vadd.f32 1e-05, %v348_v33  ;;  %562 = vmatpush.msrb.mxu0 %v545_v27  ;;  %v461_v33 = vld [vmem:[#allocation3 + $0x90] sm:$0xff] }
 0x1d0   :  { %488 = vmatpush.msrb.mxu2 %v461_v33 }
 0x1d1   :  { %1027 = vrsqrt.f32 %v349_v34  ;;  %vm356_vm3 = vweird.f32 %v349_v34  ;;  %563 = vmatpush.msrb.mxu0 %v544_v31 }
 0x1d7   :  { %v1028_v36 = vpop.eup %1027 }
 0x1d8   :  { %v351_v37 = vmul.f32 %v1028_v36, %v349_v34  ;;  %vm357_vm2 = vweird.f32 %v1028_v36  ;;  %v443_v34 = vld [vmem:[#allocation3 + $0x28] sm:$0xff] }
 0x1d9   :  { %vm358_vm4 = vmor %vm356_vm3, %vm357_vm2 }
 0x1da   :  { %v352_v38 = vmul.f32 %v1028_v36, %v351_v37  ;;  %v460_v37 = vld [vmem:[#allocation3 + $0x88] sm:$0xff] }
 0x1db   :  { %489 = vmatpush.msrb.mxu2 %v460_v37 }
 0x1dc   :  { %v353_v39 = vmul.f32 0.5, %v352_v38  ;;  %v442_v38 = vld [vmem:[#allocation3 + $0x20] sm:$0xff] }
 0x1de   :  { %v354_v40 = vsub.f32 1.5, %v353_v39  ;;  %v542_v39 = vld [vmem:[#allocation3 + $0x120] sm:$0xff] }
 0x1e0   :  { %v355_v41 = vmul.f32 %v1028_v36, %v354_v40  ;;  %v459_v40 = vld [vmem:[#allocation3 + $0x80] sm:$0xff] }
 0x1e1   :  { %490 = vmatpush.msrb.mxu2 %v459_v40 }
 0x1e2   :  { %v359_v45 = vsel %vm358_vm4, %v1028_v36, %v355_v41  ;;  %v543_v36 = vld [vmem:[#allocation3 + $0x128] sm:$0xff]  ;;  %v441_v41 = vld [vmem:[#allocation3 + $0x18] sm:$0xff] }
 0x1e3   :  { %v361_v48 = vmul.f32 %v360_v44, %v359_v45  ;;  %564 = vmatpush.msrb.mxu0 %v543_v36  ;;  %v541_v44 = vld [vmem:[#allocation3 + $0x118] sm:$0xff]  ;;  %v440_v45 = vld [vmem:[#allocation3 + $0x10] sm:$0xff]  ;;  %631 = vmatpush.msra.mxu2 %v1330_v42 }
 0x1e5   :  { %v363_v52 = vmul.f32 %v361_v48, %v325_v17  ;;  %1006 = vmatmul.msk.f32.vlgmr.msra.gmra.mxu0 %vm365_vm5, %v361_v48  ;;  %v447_v17 = vld [vmem:[#allocation3 + $0x48] sm:$0xff]  ;;  %v1116_v48 = vmov 0.0   ;;  %632 = vmatpush.msra.mxu2 %v1335_v43 }
 0x1e6   :  { %510 = vmatpush.msrb.mxu3 %v447_v17  ;;  %565 = vmatpush.msrb.mxu0 %v542_v39  ;;  %426 = vst [vmem:[#allocation2] sm:$0x1] %v1116_v48  ;;  %v753_v39 = vld [vmem:[#allocation6 + $0x30] sm:$0xff] }
 0x1e7   :  { %v364_v54 = vsub.f32 %v362_v51, %v363_v52  ;;  %v540_v51 = vld [vmem:[#allocation3 + $0x110] sm:$0xff]  ;;  %427 = vst [vmem:[#allocation2 + $0x18] sm:$0x1] %v1116_v48  ;;  %v439_v52 = vld [vmem:[#allocation3 + $0x8] sm:$0xff]  ;;  %633 = vmatpush.msra.mxu2 %v1342_v46 }
 0x1e8   :  { %511 = vmatpush.msrb.mxu3 %v446_v20  ;;  %566 = vmatpush.msrb.mxu0 %v541_v44  ;;  %428 = vst [vmem:[#allocation2 + $0x11] sm:$0x1] %v1116_v48 }
 0x1e9   :  { %1007 = vmatmul.msk.f32.vlgmr.msra.gmra.mxu3 %vm365_vm5, %v364_v54  ;;  %v539_v54 = vld [vmem:[#allocation3 + $0x108] sm:$0xff]  ;;  %429 = vst [vmem:[#allocation2 + $0x29] sm:$0x1] %v1116_v48  ;;  %634 = vmatpush.msra.mxu2 %v1349_v47  ;;  %v751_v48 = vld [vmem:[#allocation6 + $0x20] sm:$0xff] }
 0x1ea   :  { %512 = vmatpush.msrb.mxu3 %v445_v25  ;;  %567 = vmatpush.msrb.mxu0 %v540_v51  ;;  %v750_v51 = vld [vmem:[#allocation6 + $0x18] sm:$0xff] }
 0x1eb   :  { %635 = vmatpush.msra.mxu2 %v1356_v49 }
 0x1ec   :  { %513 = vmatpush.msrb.mxu3 %v444_v30  ;;  %568 = vmatpush.msrb.mxu0 %v539_v54  ;;  %v748_v54 = vld [vmem:[#allocation6 + $0x8] sm:$0xff] }
 0x1ed   :  { %636 = vmatpush.msra.mxu2 %v1363_v50 }
 0x1ee   :  { %514 = vmatpush.msrb.mxu3 %v443_v34  ;;  %569 = vmatpush.msrb.mxu0 %v538_v57 }
 0x1ef   :  { %637 = vmatpush.msra.mxu2 %v1370_v53 }
 0x1f0   :  { %515 = vmatpush.msrb.mxu3 %v442_v38  ;;  %828 = vmatpush.msra.mxu0 %v1330_v42  ;;  %v754_v38 = vld [vmem:[#allocation6 + $0x38] sm:$0xff] }
 0x1f1   :  { %638 = vmatpush.msra.mxu2 %v1377_v55 }
 0x1f2   :  { %516 = vmatpush.msrb.mxu3 %v441_v41  ;;  %829 = vmatpush.msra.mxu0 %v1335_v43  ;;  %v752_v41 = vld [vmem:[#allocation6 + $0x28] sm:$0xff] }
 0x1f3   :  { %639 = vmatpush.msra.mxu2 %v1384_v58 }
 0x1f4   :  { %517 = vmatpush.msrb.mxu3 %v440_v45  ;;  %830 = vmatpush.msra.mxu0 %v1342_v46 }
 0x1f5   :  { %640 = vmatpush.msra.mxu2 %v1393_v61 }
 0x1f6   :  { %518 = vmatpush.msrb.mxu3 %v439_v52  ;;  %831 = vmatpush.msra.mxu0 %v1349_v47  ;;  %v749_v52 = vld [vmem:[#allocation6 + $0x10] sm:$0xff] }
 0x1f7   :  { %641 = vmatpush.msra.mxu2 %v1402_v0 }
 0x1f8   :  { %519 = vmatpush.msrb.mxu3 %v438_v56  ;;  %832 = vmatpush.msra.mxu0 %v1356_v49 }
 0x1f9   :  { %642 = vmatpush.msra.mxu2 %v1412_v2 }
 0x1fa   :  { %833 = vmatpush.msra.mxu0 %v1363_v50  ;;  %763 = vmatpush.msra.mxu3 %v754_v38 }
 0x1fb   :  { %643 = vmatpush.msra.mxu2 %v1422_v4 }
 0x1fc   :  { %834 = vmatpush.msra.mxu0 %v1370_v53  ;;  %764 = vmatpush.msra.mxu3 %v753_v39 }
 0x1fd   :  { %644 = vmatpush.msra.mxu2 %v1434_v7 }
 0x1fe   :  { %835 = vmatpush.msra.mxu0 %v1377_v55  ;;  %765 = vmatpush.msra.mxu3 %v752_v41 }
 0x1ff   :  { %645 = vmatpush.msra.mxu2 %v1443_v9 }
 0x200   :  { %836 = vmatpush.msra.mxu0 %v1384_v58  ;;  %766 = vmatpush.msra.mxu3 %v751_v48 }
 0x201   :  { %646 = vmatpush.msra.mxu2 %v1459_v12 }
 0x202   :  { %837 = vmatpush.msra.mxu0 %v1393_v61  ;;  %767 = vmatpush.msra.mxu3 %v750_v51 }
 0x204   :  { %838 = vmatpush.msra.mxu0 %v1402_v0  ;;  %768 = vmatpush.msra.mxu3 %v749_v52 }
 0x206   :  { %839 = vmatpush.msra.mxu0 %v1412_v2  ;;  %769 = vmatpush.msra.mxu3 %v748_v54 }
 0x208   :  { %840 = vmatpush.msra.mxu0 %v1422_v4 }
 0x20a   :  { %841 = vmatpush.msra.mxu0 %v1434_v7 }
 0x20c   :  { %842 = vmatpush.msra.mxu0 %v1443_v9 }
 0x20e   :  { %843 = vmatpush.msra.mxu0 %v1459_v12 }
 0x262   :  { %v386_v59 = vpop.f32.mrf.mxu0 }
 0x263   :  { %v412_v62 = vperm.slane %v386_v59, 0  ;;  %v747_v59 = vld [vmem:[#allocation6] sm:$0xff] }
 0x264   :  { %770 = vmatpush.msra.mxu3 %v747_v59 }
 0x265   :  { %v413_v5 = vmul.f32 %v412_v62, %v1415_v3  ;;  %v414_v10 = vmul.f32 %v412_v62, %v1405_v1  ;;  %v415_v11 = vmul.f32 %v412_v62, %v1395_v63  ;;  %v416_v13 = vmul.f32 %v412_v62, %v1386_v60 }
 0x26c   :  { %v409_v8 = vpop.f32.mrf.mxu3 }
 0x26d   :  { %v417_v14 = vperm.slane %v409_v8, 0 }
 0x26f   :  { %v418_v15 = vadd.f32 %v417_v14, %v413_v5  ;;  %v419_v17 = vadd.f32 %v417_v14, %v414_v10  ;;  %v420_v18 = vadd.f32 %v417_v14, %v415_v11  ;;  %v421_v3 = vadd.f32 %v417_v14, %v416_v13 }
 0x271   :  { %v422_v19 = vmax.f32 %v418_v15, 0.0  ;;  %v423_v20 = vmax.f32 %v419_v17, 0.0  ;;  %v424_v1 = vmax.f32 %v420_v18, 0.0  ;;  %v425_v21 = vmax.f32 %v421_v3, 0.0 }
 0x273   :  { %430 = vst [vmem:[#allocation2 + $0x1] sm:$0xff] %v422_v19  ;;  %491 = vmatmul.f32.vlgmr.msrb.gmra.mxu2 %v422_v19 }
 0x274   :  { %431 = vst [vmem:[#allocation2 + $0x9] sm:$0xff] %v423_v20  ;;  %709 = vmatpush.msrb.mxu2 %v1466_v16 }
 0x275   :  { %432 = vst [vmem:[#allocation2 + $0x19] sm:$0xff] %v424_v1 }
 0x276   :  { %433 = vst [vmem:[#allocation2 + $0x21] sm:$0xff] %v425_v21 }
 0x27a   :  { %v434_v60 = vld [vmem:[#allocation2] sm:$0xff] }
 0x27b   :  { %520 = vmatmul.f32.vlgmr.msrb.gmra.mxu3 %v434_v60  ;;  %v533_v63 = vld [vmem:[#allocation2 + $0x2] sm:$0xff]  ;;  %494 = vmatmul.f32.gmra.mxu2 %v423_v20  ;;  %v534_v23 = vld [vmem:[#allocation2 + $0xa] sm:$0xff]  ;;  %v686_v20 = vld [vmem:[%s1643_s7] sm:$0x1] }
 0x27c   :  { %570 = vmatmul.f32.vlgmr.msrb.gmra.mxu0 %v533_v63  ;;  %v435_v22 = vld [vmem:[#allocation2 + $0x8] sm:$0xff]  ;;  %v436_v24 = vld [vmem:[#allocation2 + $0x18] sm:$0xff]  ;;  %849 = vmatpush.msrb.mxu3 %v1330_v42 }
 0x27d   :  { %v535_v25 = vld [vmem:[#allocation2 + $0x1a] sm:$0xff]  ;;  %v536_v28 = vld [vmem:[#allocation2 + $0x22] sm:$0xff] }
 0x27e   :  { %v437_v27 = vld [vmem:[#allocation2 + $0x20] sm:$0xff]  ;;  %850 = vmatpush.msrb.mxu3 %v1335_v43 }
 0x280   :  { %851 = vmatpush.msrb.mxu3 %v1342_v46 }
 0x282   :  { %852 = vmatpush.msrb.mxu3 %v1349_v47 }
 0x283   :  { %523 = vmatmul.f32.gmra.mxu3 %v435_v22  ;;  %497 = vmatmul.f32.gmra.mxu2 %v424_v1 }
 0x284   :  { %573 = vmatmul.f32.gmra.mxu0 %v534_v23  ;;  %853 = vmatpush.msrb.mxu3 %v1356_v49 }
 0x286   :  { %854 = vmatpush.msrb.mxu3 %v1363_v50 }
 0x288   :  { %855 = vmatpush.msrb.mxu3 %v1370_v53 }
 0x28a   :  { %856 = vmatpush.msrb.mxu3 %v1377_v55 }
 0x28b   :  { %526 = vmatmul.f32.gmra.mxu3 %v436_v24  ;;  %500 = vmatmul.f32.gmra.mxu2 %v425_v21  ;;  %v688_v24 = vld [vmem:[%s1644_s8] sm:$0x1] }
 0x28c   :  { %576 = vmatmul.f32.gmra.mxu0 %v535_v25  ;;  %857 = vmatpush.msrb.mxu3 %v1384_v58 }
 0x28e   :  { %858 = vmatpush.msrb.mxu3 %v1393_v61 }
 0x290   :  { %859 = vmatpush.msrb.mxu3 %v1402_v0 }
 0x292   :  { %860 = vmatpush.msrb.mxu3 %v1412_v2 }
 0x293   :  { %529 = vmatmul.f32.gmra.mxu3 %v437_v27 }
 0x294   :  { %579 = vmatmul.f32.gmra.mxu0 %v536_v28  ;;  %861 = vmatpush.msrb.mxu3 %v1422_v4 }
 0x296   :  { %862 = vmatpush.msrb.mxu3 %v1434_v7 }
 0x298   :  { %863 = vmatpush.msrb.mxu3 %v1443_v9 }
 0x29a   :  { %864 = vmatpush.msrb.mxu3 %v1459_v12 }
 0x29b   :  { %1012 = vmatmul.msk.f32.vlgmr.msra.gmra.mxu3 %vm116_vm0, %v1276_v26 }
 0x2a3   :  { %1013 = vmatmul.msk.f32.gmra.mxu3 %vm116_vm0, %v1291_v29 }
 0x2ab   :  { %1014 = vmatmul.msk.f32.gmra.mxu3 %vm116_vm0, %v1306_v32 }
 0x2b3   :  { %1015 = vmatmul.msk.f32.gmra.mxu3 %vm116_vm0, %v1321_v35 }
 0x2f6   :  { %v492_v30 = vpop.f32.mrf.mxu2 }
 0x2f9   :  { %v571_v31 = vpop.f32.mrf.mxu0 }
 0x2fe   :  { %v521_v33 = vpop.f32.mrf.mxu3  ;;  %v495_v34 = vpop.f32.mrf.mxu2 }
 0x2ff   :  { %v522_v13 = vadd.f32 %v521_v33, %v492_v30 }
 0x301   :  { %v574_v36 = vpop.f32.mrf.mxu0  ;;  %v1527_v17 = vadd.f32 %v571_v31, %v522_v13  ;;  %v883_v13 = vld [vmem:[%s1646_s10] sm:$0x1]  ;;  %s1117_s10 = smov [#allocation8]  }
 0x303   :  { %v607_v19 = vmul.f32 %v1527_v17, %v1527_v17 }
 0x306   :  { %v524_v37 = vpop.f32.mrf.mxu3  ;;  %v498_v40 = vpop.f32.mrf.mxu2 }
 0x307   :  { %v525_v10 = vadd.f32 %v524_v37, %v495_v34 }
 0x309   :  { %v577_v44 = vpop.f32.mrf.mxu0  ;;  %v1523_v15 = vadd.f32 %v574_v36, %v525_v10 }
 0x30b   :  { %v608_v3 = vmul.f32 %v1523_v15, %v1523_v15 }
 0x30e   :  { %v527_v45 = vpop.f32.mrf.mxu3  ;;  %v501_v56 = vpop.f32.mrf.mxu2 }
 0x30f   :  { %v528_v62 = vadd.f32 %v527_v45, %v498_v40 }
 0x311   :  { %v580_v8 = vpop.f32.mrf.mxu0  ;;  %v1519_v14 = vadd.f32 %v577_v44, %v528_v62 }
 0x313   :  { %v609_v18 = vmul.f32 %v1519_v14, %v1519_v14 }
 0x316   :  { %v530_v57 = vpop.f32.mrf.mxu3 }
 0x317   :  { %v531_v5 = vadd.f32 %v530_v57, %v501_v56 }
 0x319   :  { %v1515_v11 = vadd.f32 %v580_v8, %v531_v5 }
 0x31b   :  { %599 = vmatpush.msra.mxu1 %v1515_v11  ;;  %v610_v26 = vmul.f32 %v1515_v11, %v1515_v11 }
 0x31d   :  { %600 = vmatpush.msra.mxu1 %v1519_v14 }
 0x31e   :  { %v1580_v35 = vpop.f32.mrf.mxu3 }
 0x31f   :  { %601 = vmatpush.msra.mxu1 %v1523_v15  ;;  %v804_v25 = vmul.f32 %v1580_v35, %v1580_v35 }
 0x321   :  { %602 = vmatpush.msra.mxu1 %v1527_v17 }
 0x322   :  { %1008 = vmatmul.msk.f32.vlgmr.msra.gmra.mxu1 %vm257_vm1, %v1115_v6 }
 0x323   :  { %623 = vmatpush.msrb.mxu1 %v610_v26 }
 0x325   :  { %624 = vmatpush.msrb.mxu1 %v609_v18 }
 0x327   :  { %625 = vmatpush.msrb.mxu1 %v608_v3 }
 0x329   :  { %626 = vmatpush.msrb.mxu1 %v607_v19 }
 0x32a   :  { %1009 = vmatmul.msk.f32.vlgmr.msrb.gmra.mxu1 %vm257_vm1, %v1115_v6 }
 0x32b   :  { %652 = vmatpush.msra.mxu1 %v1330_v42  ;;  %v1582_v42 = vpop.f32.mrf.mxu3 }
 0x32c   :  { %v805_v23 = vmul.f32 %v1582_v42, %v1582_v42 }
 0x32d   :  { %653 = vmatpush.msra.mxu1 %v1335_v43 }
 0x32f   :  { %654 = vmatpush.msra.mxu1 %v1342_v46 }
 0x331   :  { %655 = vmatpush.msra.mxu1 %v1349_v47 }
 0x333   :  { %656 = vmatpush.msra.mxu1 %v1356_v49  ;;  %v1584_v43 = vpop.f32.mrf.mxu3 }
 0x334   :  { %v806_v63 = vmul.f32 %v1584_v43, %v1584_v43 }
 0x335   :  { %657 = vmatpush.msra.mxu1 %v1363_v50 }
 0x337   :  { %658 = vmatpush.msra.mxu1 %v1370_v53 }
 0x339   :  { %659 = vmatpush.msra.mxu1 %v1377_v55 }
 0x33b   :  { %660 = vmatpush.msra.mxu1 %v1384_v58  ;;  %v1586_v46 = vpop.f32.mrf.mxu3 }
 0x33c   :  { %v807_v21 = vmul.f32 %v1586_v46, %v1586_v46 }
 0x33d   :  { %661 = vmatpush.msra.mxu1 %v1393_v61 }
 0x33f   :  { %662 = vmatpush.msra.mxu1 %v1402_v0 }
 0x341   :  { %663 = vmatpush.msra.mxu1 %v1412_v2 }
 0x343   :  { %664 = vmatpush.msra.mxu1 %v1422_v4 }
 0x345   :  { %665 = vmatpush.msra.mxu1 %v1434_v7 }
 0x347   :  { %666 = vmatpush.msra.mxu1 %v1443_v9 }
 0x349   :  { %667 = vmatpush.msra.mxu1 %v1459_v12 }
 0x34b   :  { %796 = vmatpush.msrb.mxu1 %v1586_v46 }
 0x34d   :  { %797 = vmatpush.msrb.mxu1 %v1584_v43 }
 0x34f   :  { %798 = vmatpush.msrb.mxu1 %v1582_v42 }
 0x351   :  { %799 = vmatpush.msrb.mxu1 %v1580_v35 }
 0x39f   :  { %v604_v29 = vpop.f32.mrf.mxu1 }
 0x3a0   :  { %647 = vmatmul.f32.vlgmr.msra.gmra.mxu2 %v604_v29 }
 0x3a1   :  { %732 = vmatpush.msra.mxu2 %v1466_v16 }
 0x3a7   :  { %v628_v32 = vpop.f32.mrf.mxu1 }
 0x3a8   :  { %668 = vmatmul.f32.vlgmr.msra.gmra.mxu1 %v628_v32 }
 0x3a9   :  { %906 = vmatpush.msra.mxu1 %v1466_v16 }
 0x3b0   :  { %1016 = vmatmul.msk.f32.vlgmr.msrb.gmra.mxu1 %vm257_vm1, %v1115_v6 }
 0x423   :  { %v648_v47 = vpop.f32.mrf.mxu2 }
 0x424   :  { %v651_v49 = vmul.f32 0.001953125, %v648_v47 }
 0x425   :  { %v669_v50 = vpop.f32.mrf.mxu1 }
 0x426   :  { %v673_v53 = vmul.f32 %v651_v49, %v651_v49  ;;  %v672_v55 = vmul.f32 0.001953125, %v669_v50 }
 0x428   :  { %v674_v58 = vsub.f32 %v672_v55, %v673_v53 }
 0x42a   :  { %v675_v61 = vadd.f32 1e-05, %v674_v58 }
 0x42c   :  { %1029 = vrsqrt.f32 %v675_v61  ;;  %vm682_vm7 = vweird.f32 %v675_v61 }
 0x42d   :  { %v801_v28 = vpop.f32.mrf.mxu1 }
 0x42e   :  { %844 = vmatmul.f32.vlgmr.msra.gmra.mxu0 %v801_v28 }
 0x432   :  { %v1030_v0 = vpop.eup %1029 }
 0x433   :  { %v677_v2 = vmul.f32 %v1030_v0, %v675_v61  ;;  %vm683_vm6 = vweird.f32 %v1030_v0 }
 0x434   :  { %vm684_vm8 = vmor %vm682_vm7, %vm683_vm6 }
 0x435   :  { %v678_v4 = vmul.f32 %v1030_v0, %v677_v2 }
 0x437   :  { %v679_v7 = vmul.f32 0.5, %v678_v4 }
 0x439   :  { %v680_v9 = vsub.f32 1.5, %v679_v7 }
 0x43b   :  { %v681_v12 = vmul.f32 %v1030_v0, %v680_v9 }
 0x43d   :  { %v685_v1 = vsel %vm684_vm8, %v1030_v0, %v681_v12 }
 0x43e   :  { %v687_v60 = vmul.f32 %v686_v20, %v685_v1 }
 0x440   :  { %1010 = vmatmul.msk.f32.vlgmr.msrb.gmra.mxu2 %vm365_vm5, %v687_v60  ;;  %v689_v22 = vmul.f32 %v687_v60, %v651_v49 }
 0x441   :  { %820 = vmatpush.msrb.mxu2 %v807_v21 }
 0x442   :  { %v690_v27 = vsub.f32 %v688_v24, %v689_v22 }
 0x443   :  { %821 = vmatpush.msrb.mxu2 %v806_v63 }
 0x445   :  { %822 = vmatpush.msrb.mxu2 %v805_v23 }
 0x447   :  { %823 = vmatpush.msrb.mxu2 %v804_v25 }
 0x448   :  { %1011 = vmatmul.msk.f32.vlgmr.msra.gmra.mxu2 %vm365_vm5, %v690_v27 }
 0x449   :  { %929 = vmatpush.msra.mxu2 %v1466_v16 }
 0x450   :  { %1017 = vmatmul.msk.f32.vlgmr.msrb.gmra.mxu2 %vm257_vm1, %v1115_v6 }
 0x4ab   :  { %v845_v6 = vpop.f32.mrf.mxu0 }
 0x4ac   :  { %v848_v48 = vmul.f32 0.001953125, %v845_v6 }
 0x4ae   :  { %v870_v51 = vmul.f32 %v848_v48, %v848_v48 }
 0x4c3   :  { %v711_v30 = vpop.f32.mrf.mxu2 }
 0x4c4   :  { %v737_v31 = vperm.slane %v711_v30, 0 }
 0x4c6   :  { %v738_v33 = vmul.f32 %v737_v31, %v1527_v17  ;;  %v739_v36 = vmul.f32 %v737_v31, %v1523_v15  ;;  %v740_v37 = vmul.f32 %v737_v31, %v1519_v14  ;;  %v741_v38 = vmul.f32 %v737_v31, %v1515_v11  ;;  %v885_v17 = vld [vmem:[%s1647_s11] sm:$0x1]  ;;  %s960_s11 = sshll.u32 %s1117_s10, 4  ;;  %s961_s11 = int_to_ptr.vmem [resolvable:$true] %s960_s11 }
 0x4cb   :  { %v734_v34 = vpop.f32.mrf.mxu2 }
 0x4cc   :  { %v742_v39 = vperm.slane %v734_v34, 0 }
 0x4ce   :  { %v743_v40 = vadd.f32 %v742_v39, %v738_v33  ;;  %v744_v41 = vadd.f32 %v742_v39, %v739_v36  ;;  %v745_v16 = vadd.f32 %v742_v39, %v740_v37  ;;  %v746_v44 = vadd.f32 %v742_v39, %v741_v38 }
 0x4d3   :  { %v825_v45 = vpop.f32.mrf.mxu2 }
 0x4d4   :  { %865 = vmatmul.f32.vlgmr.msrb.gmra.mxu3 %v825_v45 }
 0x557   :  { %v866_v52 = vpop.f32.mrf.mxu3 }
 0x558   :  { %v869_v54 = vmul.f32 0.001953125, %v866_v52 }
 0x55a   :  { %v871_v56 = vsub.f32 %v869_v54, %v870_v51 }
 0x55c   :  { %v872_v57 = vadd.f32 1e-05, %v871_v56 }
 0x55e   :  { %1031 = vrsqrt.f32 %v872_v57  ;;  %vm879_vm10 = vweird.f32 %v872_v57 }
 0x564   :  { %v1032_v59 = vpop.eup %1031 }
 0x565   :  { %v874_v62 = vmul.f32 %v1032_v59, %v872_v57  ;;  %vm880_vm9 = vweird.f32 %v1032_v59 }
 0x566   :  { %vm881_vm11 = vmor %vm879_vm10, %vm880_vm9 }
 0x567   :  { %v875_v5 = vmul.f32 %v1032_v59, %v874_v62 }
 0x569   :  { %v876_v8 = vmul.f32 0.5, %v875_v5 }
 0x56b   :  { %v877_v10 = vsub.f32 1.5, %v876_v8 }
 0x56d   :  { %v878_v11 = vmul.f32 %v1032_v59, %v877_v10 }
 0x56f   :  { %v882_v14 = vsel %vm881_vm11, %v1032_v59, %v878_v11 }
 0x570   :  { %v884_v15 = vmul.f32 %v883_v13, %v882_v14 }
 0x572   :  { %v886_v26 = vmul.f32 %v884_v15, %v848_v48  ;;  %1018 = vmatmul.msk.f32.vlgmr.msra.gmra.mxu1 %vm365_vm5, %v884_v15 }
 0x574   :  { %v887_v18 = vsub.f32 %v885_v17, %v886_v26 }
 0x576   :  { %1019 = vmatmul.msk.f32.vlgmr.msra.gmra.mxu2 %vm365_vm5, %v887_v18 }
 0x5ef   :  { %v908_v3 = vpop.f32.mrf.mxu1 }
 0x5f0   :  { %v934_v19 = vperm.slane %v908_v3, 0 }
 0x5f2   :  { %v935_v29 = vmul.f32 %v934_v19, %v1580_v35  ;;  %v936_v47 = vmul.f32 %v934_v19, %v1582_v42  ;;  %v937_v49 = vmul.f32 %v934_v19, %v1584_v43  ;;  %v938_v50 = vmul.f32 %v934_v19, %v1586_v46 }
 0x5f9   :  { %v931_v32 = vpop.f32.mrf.mxu2 }
 0x5fa   :  { %v939_v53 = vperm.slane %v931_v32, 0 }
 0x5fc   :  { %v940_v55 = vadd.f32 %v939_v53, %v935_v29  ;;  %v941_v58 = vadd.f32 %v939_v53, %v936_v47  ;;  %v942_v61 = vadd.f32 %v939_v53, %v937_v49  ;;  %v943_v0 = vadd.f32 %v939_v53, %v938_v50 }
 0x5fe   :  { %v944_v2 = vadd.f32 %v940_v55, %v743_v40  ;;  %v945_v4 = vadd.f32 %v941_v58, %v744_v41  ;;  %v946_v7 = vadd.f32 %v942_v61, %v745_v16  ;;  %v947_v9 = vadd.f32 %v943_v0, %v746_v44 }
 0x600   :  { %v948_v12 = vmax.f32 %v944_v2, 0.0  ;;  %v949_v20 = vmax.f32 %v945_v4, 0.0  ;;  %v950_v1 = vmax.f32 %v946_v7, 0.0  ;;  %v951_v35 = vmax.f32 %v947_v9, 0.0 }
 0x602   :  { %952 = vst [vmem:[#allocation8] sm:$0xff] %v948_v12 }
 0x603   :  { %953 = vst [vmem:[#allocation8 + $0x8] sm:$0xff] %v949_v20 }
 0x604   :  { %954 = vst [vmem:[#allocation8 + $0x10] sm:$0xff] %v950_v1 }
 0x605   :  { %955 = vst [vmem:[#allocation8 + $0x18] sm:$0xff] %v951_v35 }
 0x606   :  { %968 = dma.vmem_to_hbm [thread:$0]  %s961_s11, 512, %s963_s0, [#allocation5], %s1112_s29, %s1112_s29, %s1113_s30  }
 0x607   :  { %1109 = dma.done.wait [#allocation5], 512  }
 0x608   :  { %1110 = vsyncadd [#allocation5], 4294966784 }
 0x609   :  { %973 = vsyncpa [#allocation4], 1 }
 0x60a   :  { %974 = vsyncpa [#allocation7], 1 }
 0x60b   :  { %975 = vsyncpa [#allocation5], 1 }

</bundles_post_ra>
